<compile_context>
chip_gen: v7x
topology: tpu7x:2x2x1
jax: 0.10.0
libtpu: 0.0.40
codegen_flags: <defaults>
</compile_context>

<pallas_src>
import math

import jax
import jax.numpy as jnp
from jax.experimental import pallas as pl
from jax.experimental.pallas import tpu as pltpu

_MATMUL_DTYPE = jnp.bfloat16   # MXU operand dtype; every jnp.dot accumulates in f32


def _encoder_kernel(xe_ref, pe_ref,
                    wq_ref, bq_ref,
                    wk_ref, bk_ref,
                    wv_ref, bv_ref,
                    wof1_ref, bof1_ref,
                    w2_ref, b2_ref,
                    o_ref):
    """One grid step == TB batch rows. All matmuls / softmax / relu on-chip."""
    TB, S, E = xe_ref.shape

    # positional-encoding add in f32 (VPU; v5e has no bf16 elementwise path)
    x = xe_ref[...].astype(jnp.float32) + pe_ref[...]                      # (TB, S, E)

    # ---- single-head self-attention, query row 0 only ----
    # The classifier head reads only position 0, so only q[:, 0, :] is needed.
    # 1/sqrt(E) is folded into wq/bq at parameter-prep time.
    x0 = x[:, 0, :].astype(_MATMUL_DTYPE)                                  # (TB, E)
    q0 = jnp.dot(x0, wq_ref[...],
                 preferred_element_type=jnp.float32) + bq_ref[...]         # (TB, E) f32

    # K / V projections as two lane-aligned matmuls (no intra-vreg lane split of a fused result)
    x2 = x.reshape(TB * S, E).astype(_MATMUL_DTYPE)                        # (TB*S, E)
    k = (jnp.dot(x2, wk_ref[...], preferred_element_type=jnp.float32)
         + bk_ref[...]).reshape(TB, S, E)                                  # (TB, S, E) f32
    v = (jnp.dot(x2, wv_ref[...], preferred_element_type=jnp.float32)
         + bv_ref[...]).reshape(TB, S, E)                                  # (TB, S, E) f32

    # row-0 scores / softmax / weighted sum: tiny, stays on VPU/XLU/EUP in f32
    scores = jnp.sum(q0[:, None, :] * k, axis=-1)                          # (TB, S)
    m = jnp.max(scores, axis=-1, keepdims=True)
    p = jnp.exp(scores - m)
    probs = p * pl.reciprocal(jnp.sum(p, axis=-1, keepdims=True), approx=True)
    attn = jnp.sum(probs[:, :, None] * v, axis=1)                          # (TB, E)

    # ---- classifier head ----
    # attention out-projection folded into fc1 (exact): h = relu(attn @ (Wo^T W1^T) + (bo W1^T + b1))
    h = jnp.dot(attn.astype(_MATMUL_DTYPE), wof1_ref[...],
                preferred_element_type=jnp.float32) + bof1_ref[...]        # (TB, A)
    h = jnp.maximum(h, 0.0)                                                # ReLU
    # TODO(synk): nn.Dropout(0.1) is identity in eval mode; training-mode masking not implemented.
    out = jnp.dot(h.astype(_MATMUL_DTYPE), w2_ref[...],
                  preferred_element_type=jnp.float32) + b2_ref[...]        # (TB, OP)
    o_ref[...] = out


def _choose_block(batch, seq, embed):
    """Batch rows per grid step, generation aware.

    Single grid step (TB = B) on 1-TensorCore chips (v5e/v6e) so the matmul M dim is not halved;
    two balanced grid steps on 2-TC chips (v7x) once the batch is big enough to feed both cores.
    Capped by a VMEM budget sized against v7x's 64 MiB (32 MiB scoped default).
    """
    try:
        kind = jax.devices()[0].device_kind.lower()
    except Exception:
        kind = ""
    two_tensorcores = ("v7" in kind) or ("7x" in kind)

    # rough live bytes per batch row inside one grid step:
    #   bf16 xe block (double-buffered): 2*2*S*E ; f32 x/k/v + bf16 casts: ~14*S*E
    per_row_bytes = 18 * seq * embed
    cap = max(8, (24 * 1024 * 1024 // per_row_bytes) // 8 * 8)   # multiple of 8 (sublane-aligned)

    if two_tensorcores and batch >= 16:
        tb = (pl.cdiv(batch, 2) + 7) // 8 * 8    # two balanced steps for the two TensorCores
    else:
        tb = batch                               # single step on 1-TC chips
    tb = min(tb, cap)
    n_steps = pl.cdiv(batch, tb)
    return tb, n_steps


def network_forward(token_ids, params):
    """Full Network.forward. Embedding gather is glue; everything else runs in the kernel."""
    emb = params["embedding"]            # (V, E), row 0 is zero (padding_idx=0)
    B, S = token_ids.shape
    E = emb.shape[1]
    A = params["w_attn_fc1"].shape[1]
    OP = params["w2T"].shape[1]          # lane-padded output width (multiple of 128)
    O = params["output_size"]

    TB, n_steps = _choose_block(B, S, E)
    B_pad = n_steps * TB
    if B_pad != B:
        # pad the int32 ids (pad value 0 == padding_idx -> zero embedding row); much cheaper
        # than padding the gathered float activations.
        token_ids = jnp.pad(token_ids, ((0, B_pad - B), (0, 0)))

    # embedding lookup (glue), emitted directly in the MXU operand dtype so the xe HBM stream is bf16.
    # TODO(synk): move the gather in-kernel (scalar-prefetched ids + const VMEM table for small vocab
    # / per-row DMA gather for large vocab) to drop this extra HBM round trip of xe.
    xe = jnp.take(emb, token_ids, axis=0).astype(_MATMUL_DTYPE)   # (B_pad, S, E)
    pe = params["pe"][:S]                                         # (S, E) f32

    weights = (params["wqT"], params["bq"],
               params["wkT"], params["bk"],
               params["wvT"], params["bv"],
               params["w_attn_fc1"], params["b_attn_fc1"],
               params["w2T"], params["b2"])

    # advisory cost estimate so XLA schedules the surrounding gather/pad/slice sensibly
    flops = (4 * B_pad * S * E * E          # K and V projections
             + 2 * B_pad * E * E            # q (row 0 only)
             + 4 * B_pad * S * E            # scores + probs.V reductions
             + 2 * B_pad * E * A            # fused out-proj + fc1
             + 2 * B_pad * A * OP)          # fc2
    bytes_accessed = (xe.size * xe.dtype.itemsize + pe.size * pe.dtype.itemsize
                      + sum(int(w.size) * w.dtype.itemsize for w in weights)
                      + B_pad * OP * 4)
    cost = pl.CostEstimate(flops=int(flops), transcendentals=int(B_pad * S),
                           bytes_accessed=int(bytes_accessed))

    # constant (weight/bias) operands: full-array blocks, constant index map (fetched once)
    def _const(a):
        return pl.BlockSpec(a.shape, lambda i, _nd=a.ndim: (0,) * _nd)

    out = pl.pallas_call(
        _encoder_kernel,
        out_shape=jax.ShapeDtypeStruct((B_pad, OP), jnp.float32),
        grid_spec=pltpu.PrefetchScalarGridSpec(
            num_scalar_prefetch=0,
            grid=(n_steps,),
            in_specs=[pl.BlockSpec((TB, S, E), lambda i: (i, 0, 0)),   # xe: TB batch rows per step
                      _const(pe)] + [_const(w) for w in weights],
            out_specs=pl.BlockSpec((TB, OP), lambda i: (i, 0)),        # 2-D lane-dense output
        ),
        compiler_params=pltpu.CompilerParams(
            dimension_semantics=("parallel",),
            vmem_limit_bytes=32 * 1024 * 1024,
        ),
        cost_estimate=cost,
    )(xe, pe, *weights)
    return out[:B, :O]


def make_positional_encoding(max_seq_length, input_size):
    # Reproduces the (slightly nonstandard) loop in PositionalEncoder.__init__:
    # for even i: pe[pos, i] = sin(pos / 10000^(2*i/E)); pe[pos, i+1] = cos(same)
    pos = jnp.arange(max_seq_length, dtype=jnp.float32)[:, None]          # (L, 1)
    i_even = jnp.arange(0, input_size, 2, dtype=jnp.float32)[None, :]     # (1, E/2)
    denom = jnp.power(jnp.float32(10000.0), 2.0 * i_even / input_size)
    angle = pos / denom                                                   # (L, E/2)
    pe = jnp.zeros((max_seq_length, input_size), dtype=jnp.float32)
    pe = pe.at[:, 0::2].set(jnp.sin(angle))
    pe = pe.at[:, 1::2].set(jnp.cos(angle))
    return pe


def init_params(key, vocab_size, embed_size, attention_unit_size, output_size,
                max_seq_length=512):
    ks = jax.random.split(key, 8)
    scale = 0.02

    emb = scale * jax.random.normal(ks[0], (vocab_size, embed_size), jnp.float32)
    emb = emb.at[0].set(0.0)   # padding_idx=0

    # nn.MultiheadAttention: in_proj_weight (3E, E), in_proj_bias (3E,)
    in_proj_w = scale * jax.random.normal(ks[1], (3 * embed_size, embed_size), jnp.float32)
    in_proj_b = scale * jax.random.normal(ks[2], (3 * embed_size,), jnp.float32)
    out_proj_w = scale * jax.random.normal(ks[3], (embed_size, embed_size), jnp.float32)
    out_proj_b = scale * jax.random.normal(ks[4], (embed_size,), jnp.float32)

    w1 = scale * jax.random.normal(ks[5], (attention_unit_size, embed_size), jnp.float32)
    b1 = scale * jax.random.normal(ks[6], (attention_unit_size,), jnp.float32)
    w2 = scale * jax.random.normal(ks[7], (output_size, attention_unit_size), jnp.float32)
    b2 = jnp.zeros((output_size,), jnp.float32)

    E, A, O = embed_size, attention_unit_size, output_size
    sm_scale = 1.0 / math.sqrt(E)

    wq, wk, wv = in_proj_w[0:E], in_proj_w[E:2 * E], in_proj_w[2 * E:3 * E]
    bq, bk, bv = in_proj_b[0:E], in_proj_b[E:2 * E], in_proj_b[2 * E:3 * E]

    # fold the 1/sqrt(E) attention scale into the q projection (one-time parameter transform)
    wqT_scaled = (wq.T * sm_scale).astype(_MATMUL_DTYPE)                   # (E, E)
    bq_scaled = (bq * sm_scale).reshape(1, E)                              # (1, E) f32

    # exact algebraic fusion of the attention out-projection into fc1:
    #   fc1(out_proj(attn)) = attn @ (Wo^T @ W1^T) + (bo @ W1^T + b1)
    w_attn_fc1 = (out_proj_w.T @ w1.T).astype(_MATMUL_DTYPE)               # (E, A)
    b_attn_fc1 = (out_proj_b @ w1.T + b1).reshape(1, A)                    # (1, A) f32

    # pad fc2 output to a lane-dense multiple of 128 (zero columns, sliced off in the wrapper)
    OP = ((O + 127) // 128) * 128
    w2T_pad = jnp.zeros((A, OP), jnp.float32).at[:, :O].set(w2.T).astype(_MATMUL_DTYPE)
    b2_pad = jnp.zeros((1, OP), jnp.float32).at[:, :O].set(b2.reshape(1, O))

    params = {
        "embedding": emb,
        "pe": make_positional_encoding(max_seq_length, E),
        "wqT": wqT_scaled, "bq": bq_scaled,
        "wkT": wk.T.astype(_MATMUL_DTYPE), "bk": bk.reshape(1, E),
        "wvT": wv.T.astype(_MATMUL_DTYPE), "bv": bv.reshape(1, E),
        "w_attn_fc1": w_attn_fc1, "b_attn_fc1": b_attn_fc1,
        "w2T": w2T_pad, "b2": b2_pad,
        "output_size": O,
    }
    return params


if __name__ == "__main__":
    vocab_size, embed_size, attention_unit_size, output_size = 50, 32, 64, 16
    B, S = 2, 8

    key = jax.random.PRNGKey(0)
    k_param, k_tok = jax.random.split(key)
    params = init_params(k_param, vocab_size, embed_size, attention_unit_size, output_size)

    token_ids = jax.random.randint(k_tok, (B, S), minval=0, maxval=vocab_size, dtype=jnp.int32)

    out = network_forward(token_ids, params)
    jax.block_until_ready(out)
    assert out.shape == (B, output_size)
    print("KERNEL_OK")
</pallas_src>

<mosaic_0001>
module attributes {stable_mosaic.version = 11 : i64} {
  func.func @_encoder_kernel(%arg0: i32, %arg1: memref<2x8x32xbf16, #tpu.memory_space<vmem>>, %arg2: memref<8x32xf32, #tpu.memory_space<vmem>>, %arg3: memref<32x32xbf16, #tpu.memory_space<vmem>>, %arg4: memref<1x32xf32, #tpu.memory_space<vmem>>, %arg5: memref<32x32xbf16, #tpu.memory_space<vmem>>, %arg6: memref<1x32xf32, #tpu.memory_space<vmem>>, %arg7: memref<32x32xbf16, #tpu.memory_space<vmem>>, %arg8: memref<1x32xf32, #tpu.memory_space<vmem>>, %arg9: memref<32x64xbf16, #tpu.memory_space<vmem>>, %arg10: memref<1x64xf32, #tpu.memory_space<vmem>>, %arg11: memref<64x128xbf16, #tpu.memory_space<vmem>>, %arg12: memref<1x128xf32, #tpu.memory_space<vmem>>, %arg13: memref<2x128xf32, #tpu.memory_space<vmem>>) attributes {dimension_semantics = [#tpu.dimension_semantics<parallel>], iteration_bounds = array<i64: 1>, scalar_prefetch = 0 : i64, scratch_operands = 0 : i64, tpu.core_type = #tpu.core_type<tc>, window_params = [{transform_indices = @transform_0, window_bounds = array<i64: 2, 8, 32>}, {pipeline_mode = #tpu.pipeline_mode<synchronous>, transform_indices = @transform_1, window_bounds = array<i64: 8, 32>}, {pipeline_mode = #tpu.pipeline_mode<synchronous>, transform_indices = @transform_2, window_bounds = array<i64: 32, 32>}, {pipeline_mode = #tpu.pipeline_mode<synchronous>, transform_indices = @transform_3, window_bounds = array<i64: 1, 32>}, {pipeline_mode = #tpu.pipeline_mode<synchronous>, transform_indices = @transform_4, window_bounds = array<i64: 32, 32>}, {pipeline_mode = #tpu.pipeline_mode<synchronous>, transform_indices = @transform_5, window_bounds = array<i64: 1, 32>}, {pipeline_mode = #tpu.pipeline_mode<synchronous>, transform_indices = @transform_6, window_bounds = array<i64: 32, 32>}, {pipeline_mode = #tpu.pipeline_mode<synchronous>, transform_indices = @transform_7, window_bounds = array<i64: 1, 32>}, {pipeline_mode = #tpu.pipeline_mode<synchronous>, transform_indices = @transform_8, window_bounds = array<i64: 32, 64>}, {pipeline_mode = #tpu.pipeline_mode<synchronous>, transform_indices = @transform_9, window_bounds = array<i64: 1, 64>}, {pipeline_mode = #tpu.pipeline_mode<synchronous>, transform_indices = @transform_10, window_bounds = array<i64: 64, 128>}, {pipeline_mode = #tpu.pipeline_mode<synchronous>, transform_indices = @transform_11, window_bounds = array<i64: 1, 128>}, {transform_indices = @transform_12, window_bounds = array<i64: 2, 128>}]} {
    %c0 = arith.constant 0 : index
    %c0_0 = arith.constant 0 : index
    %c0_1 = arith.constant 0 : index
    %0 = vector.load %arg1[%c0, %c0_0, %c0_1] : memref<2x8x32xbf16, #tpu.memory_space<vmem>>, vector<2x8x32xbf16>
    %1 = arith.extf %0 : vector<2x8x32xbf16> to vector<2x8x32xf32>
    %c0_2 = arith.constant 0 : index
    %c0_3 = arith.constant 0 : index
    %2 = vector.load %arg2[%c0_2, %c0_3] : memref<8x32xf32, #tpu.memory_space<vmem>>, vector<8x32xf32>
    %3 = vector.shape_cast %2 : vector<8x32xf32> to vector<1x8x32xf32>
    %4 = vector.broadcast %3 : vector<1x8x32xf32> to vector<2x8x32xf32>
    %5 = arith.addf %1, %4 : vector<2x8x32xf32>
    %6 = vector.extract_strided_slice %5 {offsets = [0, 0, 0], sizes = [2, 1, 32], strides = [1, 1, 1]} : vector<2x8x32xf32> to vector<2x1x32xf32>
    %7 = vector.shape_cast %6 : vector<2x1x32xf32> to vector<2x32xf32>
    %8 = arith.truncf %7 : vector<2x32xf32> to vector<2x32xbf16>
    %c0_4 = arith.constant 0 : index
    %c0_5 = arith.constant 0 : index
    %9 = vector.load %arg3[%c0_4, %c0_5] : memref<32x32xbf16, #tpu.memory_space<vmem>>, vector<32x32xbf16>
    %cst = arith.constant dense<0.000000e+00> : vector<2x32xf32>
    %10 = tpu.matmul %8, %9, %cst {dimension_numbers = #tpu.dot_dimension_numbers<[1], [0], [0], [1], [0, 0, 1, 1], [], []>} : vector<2x32xbf16>, vector<32x32xbf16>, vector<2x32xf32> -> vector<2x32xf32>
    %c0_6 = arith.constant 0 : index
    %c0_7 = arith.constant 0 : index
    %11 = vector.load %arg4[%c0_6, %c0_7] : memref<1x32xf32, #tpu.memory_space<vmem>>, vector<1x32xf32>
    %12 = vector.broadcast %11 : vector<1x32xf32> to vector<2x32xf32>
    %13 = arith.addf %10, %12 : vector<2x32xf32>
    %14 = vector.shape_cast %5 : vector<2x8x32xf32> to vector<16x32xf32>
    %15 = arith.truncf %14 : vector<16x32xf32> to vector<16x32xbf16>
    %c0_8 = arith.constant 0 : index
    %c0_9 = arith.constant 0 : index
    %16 = vector.load %arg5[%c0_8, %c0_9] : memref<32x32xbf16, #tpu.memory_space<vmem>>, vector<32x32xbf16>
    %cst_10 = arith.constant dense<0.000000e+00> : vector<16x32xf32>
    %17 = tpu.matmul %15, %16, %cst_10 {dimension_numbers = #tpu.dot_dimension_numbers<[1], [0], [0], [1], [0, 0, 1, 1], [], []>} : vector<16x32xbf16>, vector<32x32xbf16>, vector<16x32xf32> -> vector<16x32xf32>
    %c0_11 = arith.constant 0 : index
    %c0_12 = arith.constant 0 : index
    %18 = vector.load %arg6[%c0_11, %c0_12] : memref<1x32xf32, #tpu.memory_space<vmem>>, vector<1x32xf32>
    %19 = vector.broadcast %18 : vector<1x32xf32> to vector<16x32xf32>
    %20 = arith.addf %17, %19 : vector<16x32xf32>
    %21 = vector.shape_cast %20 : vector<16x32xf32> to vector<2x8x32xf32>
    %c0_13 = arith.constant 0 : index
    %c0_14 = arith.constant 0 : index
    %22 = vector.load %arg7[%c0_13, %c0_14] : memref<32x32xbf16, #tpu.memory_space<vmem>>, vector<32x32xbf16>
    %cst_15 = arith.constant dense<0.000000e+00> : vector<16x32xf32>
    %23 = tpu.matmul %15, %22, %cst_15 {dimension_numbers = #tpu.dot_dimension_numbers<[1], [0], [0], [1], [0, 0, 1, 1], [], []>} : vector<16x32xbf16>, vector<32x32xbf16>, vector<16x32xf32> -> vector<16x32xf32>
    %c0_16 = arith.constant 0 : index
    %c0_17 = arith.constant 0 : index
    %24 = vector.load %arg8[%c0_16, %c0_17] : memref<1x32xf32, #tpu.memory_space<vmem>>, vector<1x32xf32>
    %25 = vector.broadcast %24 : vector<1x32xf32> to vector<16x32xf32>
    %26 = arith.addf %23, %25 : vector<16x32xf32>
    %27 = vector.shape_cast %26 : vector<16x32xf32> to vector<2x8x32xf32>
    %28 = vector.shape_cast %13 : vector<2x32xf32> to vector<2x1x32xf32>
    %29 = vector.broadcast %28 : vector<2x1x32xf32> to vector<2x8x32xf32>
    %30 = arith.mulf %29, %21 : vector<2x8x32xf32>
    %cst_18 = arith.constant dense<0.000000e+00> : vector<2x8xf32>
    %31 = vector.multi_reduction <add>, %30, %cst_18 [2] : vector<2x8x32xf32> to vector<2x8xf32>
    %cst_19 = arith.constant dense<0xFF800000> : vector<2xf32>
    %32 = vector.multi_reduction <maximumf>, %31, %cst_19 [1] : vector<2x8xf32> to vector<2xf32>
    %33 = vector.shape_cast %32 : vector<2xf32> to vector<2x1xf32>
    %34 = vector.broadcast %33 : vector<2x1xf32> to vector<2x8xf32>
    %35 = arith.subf %31, %34 : vector<2x8xf32>
    %36 = math.exp %35 : vector<2x8xf32>
    %cst_20 = arith.constant dense<0.000000e+00> : vector<2xf32>
    %37 = vector.multi_reduction <add>, %36, %cst_20 [1] : vector<2x8xf32> to vector<2xf32>
    %38 = vector.shape_cast %37 : vector<2xf32> to vector<2x1xf32>
    %39 = tpu.reciprocal %38 {approx = true} : vector<2x1xf32> -> vector<2x1xf32>
    %40 = vector.broadcast %39 : vector<2x1xf32> to vector<2x8xf32>
    %41 = arith.mulf %36, %40 : vector<2x8xf32>
    %42 = vector.shape_cast %41 : vector<2x8xf32> to vector<2x8x1xf32>
    %43 = vector.broadcast %42 : vector<2x8x1xf32> to vector<2x8x32xf32>
    %44 = arith.mulf %43, %27 : vector<2x8x32xf32>
    %cst_21 = arith.constant dense<0.000000e+00> : vector<2x32xf32>
    %45 = vector.multi_reduction <add>, %44, %cst_21 [1] : vector<2x8x32xf32> to vector<2x32xf32>
    %46 = arith.truncf %45 : vector<2x32xf32> to vector<2x32xbf16>
    %c0_22 = arith.constant 0 : index
    %c0_23 = arith.constant 0 : index
    %47 = vector.load %arg9[%c0_22, %c0_23] : memref<32x64xbf16, #tpu.memory_space<vmem>>, vector<32x64xbf16>
    %cst_24 = arith.constant dense<0.000000e+00> : vector<2x64xf32>
    %48 = tpu.matmul %46, %47, %cst_24 {dimension_numbers = #tpu.dot_dimension_numbers<[1], [0], [0], [1], [0, 0, 1, 1], [], []>} : vector<2x32xbf16>, vector<32x64xbf16>, vector<2x64xf32> -> vector<2x64xf32>
    %c0_25 = arith.constant 0 : index
    %c0_26 = arith.constant 0 : index
    %49 = vector.load %arg10[%c0_25, %c0_26] : memref<1x64xf32, #tpu.memory_space<vmem>>, vector<1x64xf32>
    %50 = vector.broadcast %49 : vector<1x64xf32> to vector<2x64xf32>
    %51 = arith.addf %48, %50 : vector<2x64xf32>
    %cst_27 = arith.constant 0.000000e+00 : f32
    %52 = vector.broadcast %cst_27 : f32 to vector<2x64xf32>
    %53 = arith.maximumf %51, %52 : vector<2x64xf32>
    %54 = arith.truncf %53 : vector<2x64xf32> to vector<2x64xbf16>
    %c0_28 = arith.constant 0 : index
    %c0_29 = arith.constant 0 : index
    %55 = vector.load %arg11[%c0_28, %c0_29] : memref<64x128xbf16, #tpu.memory_space<vmem>>, vector<64x128xbf16>
    %cst_30 = arith.constant dense<0.000000e+00> : vector<2x128xf32>
    %56 = tpu.matmul %54, %55, %cst_30 {dimension_numbers = #tpu.dot_dimension_numbers<[1], [0], [0], [1], [0, 0, 1, 1], [], []>} : vector<2x64xbf16>, vector<64x128xbf16>, vector<2x128xf32> -> vector<2x128xf32>
    %c0_31 = arith.constant 0 : index
    %c0_32 = arith.constant 0 : index
    %57 = vector.load %arg12[%c0_31, %c0_32] : memref<1x128xf32, #tpu.memory_space<vmem>>, vector<1x128xf32>
    %58 = vector.broadcast %57 : vector<1x128xf32> to vector<2x128xf32>
    %59 = arith.addf %56, %58 : vector<2x128xf32>
    %c0_33 = arith.constant 0 : index
    %c0_34 = arith.constant 0 : index
    %60 = vector.load %arg13[%c0_33, %c0_34] : memref<2x128xf32, #tpu.memory_space<vmem>>, vector<2x128xf32>
    tpu.vector_store %arg13[%c0_33, %c0_34], %59 {strides = array<i32>} : memref<2x128xf32, #tpu.memory_space<vmem>>, vector<2x128xf32>,
    return
  }
  func.func @transform_0(%arg0: i32) -> (i32, i32, i32) {
    %c0_i32 = arith.constant 0 : i32
    %c0_i32_0 = arith.constant 0 : i32
    %c0_i32_1 = arith.constant 0 : i32
    return %arg0, %c0_i32, %c0_i32_0 : i32, i32, i32
  }
  func.func @transform_1(%arg0: i32) -> (i32, i32) {
    %c0_i32 = arith.constant 0 : i32
    %c0_i32_0 = arith.constant 0 : i32
    %c0_i32_1 = arith.constant 0 : i32
    return %c0_i32, %c0_i32_0 : i32, i32
  }
  func.func @transform_2(%arg0: i32) -> (i32, i32) {
    %c0_i32 = arith.constant 0 : i32
    %c0_i32_0 = arith.constant 0 : i32
    %c0_i32_1 = arith.constant 0 : i32
    return %c0_i32, %c0_i32_0 : i32, i32
  }
  func.func @transform_3(%arg0: i32) -> (i32, i32) {
    %c0_i32 = arith.constant 0 : i32
    %c0_i32_0 = arith.constant 0 : i32
    %c0_i32_1 = arith.constant 0 : i32
    return %c0_i32, %c0_i32_0 : i32, i32
  }
  func.func @transform_4(%arg0: i32) -> (i32, i32) {
    %c0_i32 = arith.constant 0 : i32
    %c0_i32_0 = arith.constant 0 : i32
    %c0_i32_1 = arith.constant 0 : i32
    return %c0_i32, %c0_i32_0 : i32, i32
  }
  func.func @transform_5(%arg0: i32) -> (i32, i32) {
    %c0_i32 = arith.constant 0 : i32
    %c0_i32_0 = arith.constant 0 : i32
    %c0_i32_1 = arith.constant 0 : i32
    return %c0_i32, %c0_i32_0 : i32, i32
  }
  func.func @transform_6(%arg0: i32) -> (i32, i32) {
    %c0_i32 = arith.constant 0 : i32
    %c0_i32_0 = arith.constant 0 : i32
    %c0_i32_1 = arith.constant 0 : i32
    return %c0_i32, %c0_i32_0 : i32, i32
  }
  func.func @transform_7(%arg0: i32) -> (i32, i32) {
    %c0_i32 = arith.constant 0 : i32
    %c0_i32_0 = arith.constant 0 : i32
    %c0_i32_1 = arith.constant 0 : i32
    return %c0_i32, %c0_i32_0 : i32, i32
  }
  func.func @transform_8(%arg0: i32) -> (i32, i32) {
    %c0_i32 = arith.constant 0 : i32
    %c0_i32_0 = arith.constant 0 : i32
    %c0_i32_1 = arith.constant 0 : i32
    return %c0_i32, %c0_i32_0 : i32, i32
  }
  func.func @transform_9(%arg0: i32) -> (i32, i32) {
    %c0_i32 = arith.constant 0 : i32
    %c0_i32_0 = arith.constant 0 : i32
    %c0_i32_1 = arith.constant 0 : i32
    return %c0_i32, %c0_i32_0 : i32, i32
  }
  func.func @transform_10(%arg0: i32) -> (i32, i32) {
    %c0_i32 = arith.constant 0 : i32
    %c0_i32_0 = arith.constant 0 : i32
    %c0_i32_1 = arith.constant 0 : i32
    return %c0_i32, %c0_i32_0 : i32, i32
  }
  func.func @transform_11(%arg0: i32) -> (i32, i32) {
    %c0_i32 = arith.constant 0 : i32
    %c0_i32_0 = arith.constant 0 : i32
    %c0_i32_1 = arith.constant 0 : i32
    return %c0_i32, %c0_i32_0 : i32, i32
  }
  func.func @transform_12(%arg0: i32) -> (i32, i32) {
    %c0_i32 = arith.constant 0 : i32
    %c0_i32_0 = arith.constant 0 : i32
    return %arg0, %c0_i32 : i32, i32
  }
}

</mosaic_0001>

<bundles_post_ra>
// kernel: tpu_custom_call.1
= control target key start
LH: loop header
LB: loop body
LE: loop exit
PB: predicated region body
PF: predicated region fallthrough
CT: control target
= control target key end

     0   :  { %17 = vsyncpa [#allocation3], 0  ;;  %s1194_s0 = inlined_call_operand.hbm [shape: bf16[2,8,32], index: 0, kind: input, shape index: {}]   ;;  %s1195_s1 = inlined_call_operand.hbm [shape: f32[8,32], index: 1, kind: input, shape index: {}]   ;;  %s1196_s2 = inlined_call_operand.hbm [shape: bf16[32,32], index: 2, kind: input, shape index: {}]   ;;  %s1197_s3 = inlined_call_operand.vmem [shape: f32[1,32], index: 3, kind: input, shape index: {}]   ;;  %s1198_s4 = inlined_call_operand.hbm [shape: bf16[32,32], index: 4, kind: input, shape index: {}]   ;;  %s1199_s5 = inlined_call_operand.vmem [shape: f32[1,32], index: 5, kind: input, shape index: {}]   ;;  %s1200_s6 = inlined_call_operand.hbm [shape: bf16[32,32], index: 6, kind: input, shape index: {}]   ;;  %s1201_s7 = inlined_call_operand.vmem [shape: f32[1,32], index: 7, kind: input, shape index: {}]   ;;  %s1202_s8 = inlined_call_operand.hbm [shape: bf16[32,64], index: 8, kind: input, shape index: {}]   ;;  %s1203_s9 = inlined_call_operand.vmem [shape: f32[1,64], index: 9, kind: input, shape index: {}]   ;;  %s1204_s10 = inlined_call_operand.vmem [shape: bf16[64,128], index: 10, kind: input, shape index: {}]   ;;  %s1205_s11 = inlined_call_operand.vmem [shape: f32[1,128], index: 11, kind: input, shape index: {}]   ;;  %s1206_s12 = inlined_call_operand.hbm [shape: f32[2,128], index: 12, kind: output, shape index: {}]  }
   0x1   :  { %18 = vsyncpa [#allocation6], 0 }
   0x2   :  { %19 = vsyncpa [#allocation9], 0 }
   0x3   :  { %20 = vsyncpa [#allocation12], 0 }
   0x4   :  { %21 = vsyncpa [#allocation4], 0  ;;  %s938_s21 = smov [#allocation5]   ;;  %s774_s25 = scalar_lea.hbm %s1195_s1, 128 }
   0x5   :  { %s40_s22 = sshll.u32 %s938_s21, 4  ;;  %p775_p0 = scmp.ne.s32.totalorder %s1195_s1, %s774_s25  ;;  %s41_s22 = int_to_ptr.vmem [resolvable:$true] %s40_s22 }
   0x6   :  { %p778_p1 = scmp.lt.u32.totalorder %s774_s25, %s1195_s1 }
   0x8   :  { %p780_p2 = pnand %p778_p1, %p775_p0 }
   0xa   :  { %783 = shalt.err (!%p780_p2)
}
   0xb   :  { %s784_s30 = scalar_lea.vmem %s41_s22, 128  ;;  %p789_p4 = scmp.lt.s32.totalorder %s41_s22, %s41_s22 }
   0xc   :  { %p785_p3 = scmp.ne.s32.totalorder %s41_s22, %s784_s30  ;;  %p790_p5 = scmp.lt.s32.totalorder %s784_s30, %s784_s30 }
   0xe   :  { %p791_p6 = por %p790_p5, %p789_p4 }
  0x10   :  { %p792_p7 = pnand %p791_p6, %p785_p3 }
  0x12   :  { %795 = shalt.err (!%p792_p7)
}
  0x13   :  { %43 = dma.hbm_to_vmem [thread:$0]  %s1195_s1, 128, %s41_s22, [#allocation6]  }
  0x14   :  { %s939_s15 = smov [#allocation8]   ;;  %s940_s17 = smov [#allocation2]  }
  0x15   :  { %s63_s16 = sshll.u32 %s939_s15, 4  ;;  %s27_s18 = sshll.u32 %s940_s17, 4  ;;  %s64_s16 = int_to_ptr.vmem [resolvable:$true] %s63_s16  ;;  %s28_s18 = int_to_ptr.vmem [resolvable:$true] %s27_s18 }
  0x16   :  { %s796_s21 = scalar_lea.hbm %s1198_s4, 256 }
  0x17   :  { %p797_p8 = scmp.ne.s32.totalorder %s1198_s4, %s796_s21  ;;  %p800_p9 = scmp.lt.u32.totalorder %s796_s21, %s1198_s4 }
  0x19   :  { %p802_p10 = pnand %p800_p9, %p797_p8 }
  0x1b   :  { %805 = shalt.err (!%p802_p10)
}
  0x1c   :  { %s806_s1 = scalar_lea.vmem %s64_s16, 256  ;;  %p811_p12 = scmp.lt.s32.totalorder %s64_s16, %s64_s16 }
  0x1d   :  { %p807_p11 = scmp.ne.s32.totalorder %s64_s16, %s806_s1  ;;  %p812_p13 = scmp.lt.s32.totalorder %s806_s1, %s806_s1 }
  0x1f   :  { %p813_p0 = por %p812_p13, %p811_p12 }
  0x21   :  { %p814_p1 = pnand %p813_p0, %p807_p11 }
  0x23   :  { %817 = shalt.err (!%p814_p1)
}
  0x24   :  { %s941_s22 = smov 64   ;;  %s942_s27 = smov 4  }
  0x25   :  { %69 = dma.hbm_to_vmem [thread:$0]  %s1198_s4, 256, %s64_s16, [#allocation9], %s941_s22, %s941_s22, %s942_s27  }
  0x26   :  { %s818_s14 = scalar_lea.hbm %s1194_s0, 128 }
  0x27   :  { %p819_p2 = scmp.ne.s32.totalorder %s1194_s0, %s818_s14  ;;  %p822_p3 = scmp.lt.u32.totalorder %s818_s14, %s1194_s0 }
  0x29   :  { %p824_p4 = pnand %p822_p3, %p819_p2 }
  0x2b   :  { %827 = shalt.err (!%p824_p4)
}
  0x2c   :  { %s828_s21 = scalar_lea.vmem %s28_s18, 128  ;;  %p833_p6 = scmp.lt.s32.totalorder %s28_s18, %s28_s18 }
  0x2d   :  { %p829_p5 = scmp.ne.s32.totalorder %s28_s18, %s828_s21  ;;  %p834_p7 = scmp.lt.s32.totalorder %s828_s21, %s828_s21 }
  0x2f   :  { %p835_p8 = por %p834_p7, %p833_p6 }
  0x31   :  { %p836_p9 = pnand %p835_p8, %p829_p5 }
  0x33   :  { %839 = shalt.err (!%p836_p9)
}
  0x34   :  { %33 = dma.hbm_to_vmem [thread:$0]  %s1194_s0, 128, %s28_s18, [#allocation3], %s941_s22, %s941_s22, %s942_s27  }
  0x35   :  { %s943_s23 = smov [#allocation7]   ;;  %s944_s25 = smov [#allocation10]  }
  0x36   :  { %s49_s24 = sshll.u32 %s943_s23, 4  ;;  %s77_s26 = sshll.u32 %s944_s25, 4  ;;  %s50_s24 = int_to_ptr.vmem [resolvable:$true] %s49_s24  ;;  %s78_s26 = int_to_ptr.vmem [resolvable:$true] %s77_s26 }
  0x37   :  { %s840_s29 = scalar_lea.hbm %s1196_s2, 256 }
  0x38   :  { %p841_p10 = scmp.ne.s32.totalorder %s1196_s2, %s840_s29  ;;  %p844_p11 = scmp.lt.u32.totalorder %s840_s29, %s1196_s2 }
  0x3a   :  { %p846_p12 = pnand %p844_p11, %p841_p10 }
  0x3c   :  { %849 = shalt.err (!%p846_p12)
}
  0x3d   :  { %s850_s0 = scalar_lea.vmem %s50_s24, 256  ;;  %p855_p0 = scmp.lt.s32.totalorder %s50_s24, %s50_s24 }
  0x3e   :  { %p851_p13 = scmp.ne.s32.totalorder %s50_s24, %s850_s0  ;;  %p856_p1 = scmp.lt.s32.totalorder %s850_s0, %s850_s0 }
  0x40   :  { %p857_p2 = por %p856_p1, %p855_p0 }
  0x42   :  { %p858_p3 = pnand %p857_p2, %p851_p13 }
  0x44   :  { %861 = shalt.err (!%p858_p3)
}
  0x45   :  { %55 = dma.hbm_to_vmem [thread:$0]  %s1196_s2, 256, %s50_s24, [#allocation6], %s941_s22, %s941_s22, %s942_s27  }
  0x46   :  { %s862_s21 = scalar_lea.hbm %s1200_s6, 256 }
  0x47   :  { %p863_p4 = scmp.ne.s32.totalorder %s1200_s6, %s862_s21  ;;  %p866_p5 = scmp.lt.u32.totalorder %s862_s21, %s1200_s6 }
  0x49   :  { %p868_p6 = pnand %p866_p5, %p863_p4 }
  0x4b   :  { %871 = shalt.err (!%p868_p6)
}
  0x4c   :  { %s872_s1 = scalar_lea.vmem %s78_s26, 256  ;;  %p877_p8 = scmp.lt.s32.totalorder %s78_s26, %s78_s26 }
  0x4d   :  { %p873_p7 = scmp.ne.s32.totalorder %s78_s26, %s872_s1  ;;  %p878_p9 = scmp.lt.s32.totalorder %s872_s1, %s872_s1 }
  0x4f   :  { %p879_p10 = por %p878_p9, %p877_p8 }
  0x51   :  { %p880_p11 = pnand %p879_p10, %p873_p7 }
  0x53   :  { %883 = shalt.err (!%p880_p11)
}
  0x54   :  { %83 = dma.hbm_to_vmem [thread:$0]  %s1200_s6, 256, %s78_s26, [#allocation9], %s941_s22, %s941_s22, %s942_s27  }
  0x55   :  { %s945_s28 = smov [#allocation11]   ;;  %s884_s14 = scalar_lea.hbm %s1202_s8, 256 }
  0x56   :  { %s91_s29 = sshll.u32 %s945_s28, 4  ;;  %p885_p12 = scmp.ne.s32.totalorder %s1202_s8, %s884_s14  ;;  %s92_s29 = int_to_ptr.vmem [resolvable:$true] %s91_s29 }
  0x57   :  { %p888_p13 = scmp.lt.u32.totalorder %s884_s14, %s1202_s8 }
  0x59   :  { %p890_p0 = pnand %p888_p13, %p885_p12 }
  0x5b   :  { %893 = shalt.err (!%p890_p0)
}
  0x5c   :  { %s894_s19 = scalar_lea.vmem %s92_s29, 256  ;;  %p899_p2 = scmp.lt.s32.totalorder %s92_s29, %s92_s29 }
  0x5d   :  { %p895_p1 = scmp.ne.s32.totalorder %s92_s29, %s894_s19  ;;  %p900_p3 = scmp.lt.s32.totalorder %s894_s19, %s894_s19 }
  0x5f   :  { %p901_p4 = por %p900_p3, %p899_p2 }
  0x61   :  { %p902_p5 = pnand %p901_p4, %p895_p1 }
  0x63   :  { %905 = shalt.err (!%p902_p5)
}
  0x64   :  { %97 = dma.hbm_to_vmem [thread:$0]  %s1202_s8, 256, %s92_s29, [#allocation12], %s941_s22, %s941_s22, %s942_s27  }
  0x65   :  { %928 = dma.done.wait [#allocation3], 128  }
  0x66   :  { %929 = vsyncadd [#allocation3], 4294967168 }
  0x67   :  { %930 = dma.done.wait [#allocation6], 384  }
  0x68   :  { %931 = vsyncadd [#allocation6], 4294966912 }
  0x69   :  { %932 = dma.done.wait [#allocation9], 512  }
  0x6a   :  { %933 = vsyncadd [#allocation9], 4294966784 }
  0x6b   :  { %934 = dma.done.wait [#allocation12], 256  }
  0x6c   :  { %935 = vsyncadd [#allocation12], 4294967040  ;;  %v946_v0 = vmov 0.0   ;;  %vm947_vm0 = vmmov 0   ;;  %v756_v1 = vld [vmem:[#allocation7] sm:$0xff]   ;;  %v757_v2 = vld [vmem:[#allocation7 + $0x8] sm:$0xff]   ;;  %v343_v21 = vlaneseq }
  0x6d   :  { %697 = vmatprep.subr.bf16.mxu1 %v946_v0  ;;  %701 = vmatprep.mubr.msk.bf16.mxu1 %vm947_vm0, %v946_v0  ;;  %v677_v3 = vld [vmem:[#allocation2] sm:$0xff]   ;;  %v127_v4 = vld [vmem:[#allocation5] sm:$0xff]  ;;  %vm148_vm1 = vcmask 1041409   ;;  %vm163_vm2 = vcmask 261120   ;;  %v948_v19 = vmov 1966171168  }
  0x6e   :  { %713 = vmatprep.subr.bf16.mxu0 %v946_v0  ;;  %717 = vmatprep.mubr.msk.bf16.mxu0 %vm947_vm0, %v946_v0  ;;  %v678_v5 = vunpack.c.l.bf16 %v677_v3  ;;  %v679_v6 = vunpack.c.h.bf16 %v677_v3  ;;  %v758_v15 = vld [vmem:[#allocation8] sm:$0xff]   ;;  %v759_v17 = vld [vmem:[#allocation8 + $0x8] sm:$0xff]   ;;  %v341_v20 = vunpack.c.l.s4 %v948_v19  ;;  %v1123_v23 = vshrl.u32 %v343_v21, 7  ;;  %s950_s13 = smov [#allocation13]  }
  0x6f   :  { %698 = vmatpush3.bf16.msra.mxu1 %v756_v1  ;;  %v654_v24 = vld [vmem:[%s1197_s3] ss:$0 sm:$0xff]  ;;  %v383_v49 = vand.u32 127, %v343_v21  ;;  %vm394_vm3 = vcmask 58368   ;;  %v949_v57 = vmov 0   ;;  %vm591_vm4 = vcmask 523264  }
  0x70   :  { %699 = vmatprep.subr.bf16.mxu1 %v946_v0  ;;  %v128_v7 = vadd.f32 %v678_v5, %v127_v4  ;;  %v129_v8 = vadd.f32 %v679_v6, %v127_v4  ;;  %v342_v22 = vunpack.c.0.s8 %v341_v20  ;;  %v1130_v34 = vsub.s32 0, %v1123_v23  ;;  %v658_v35 = vld [vmem:[%s1199_s5] ss:$0 sm:$0xff]  ;;  %755 = vset.pattern.permute.xlu0 %v949_v57  ;;  %v760_v5 = vld [vmem:[#allocation10] sm:$0xff]   ;;  %v761_v6 = vld [vmem:[#allocation10 + $0x8] sm:$0xff]  }
  0x71   :  { %v386_v51 = vsub.s32 %v383_v49, %v1123_v23  ;;  %754 = vset.pattern.permute.xlu1 %v949_v57  ;;  %v405_v58 = vsub.s32 1, %v1123_v23  ;;  %714 = vmatpush3.bf16.msra.mxu0 %v760_v5 }
  0x72   :  { %v130_v9 = vpack.c.bf16 %v128_v7, %v128_v7  ;;  %v131_v10 = vpack.c.bf16 %v129_v8, %v129_v8  ;;  %v1116_v18 = vpack.c.bf16 %v129_v8, %v128_v7  ;;  %v345_v25 = vsub.s32 %v342_v22, %v1123_v23  ;;  %715 = vmatprep.subr.bf16.mxu0 %v946_v0  ;;  %v762_v23 = vld [vmem:[#allocation11] sm:$0xff]  }
  0x73   :  { %700 = vmatpush3.bf16.msra.mxu1 %v757_v2 }
  0x74   :  { %705 = vmatprep.subr.bf16.mxu1 %v946_v0  ;;  %v145_v11 = vunpack.c.l.b16 %v130_v9  ;;  %v146_v12 = vunpack.c.l.b16 %v131_v10 }
  0x75   :  { %716 = vmatpush3.bf16.msra.mxu0 %v761_v6 }
  0x76   :  { %v147_v13 = vrot.slane %v146_v12, 7  ;;  %729 = vmatprep.subr.bf16.mxu0 %v946_v0 }
  0x78   :  { %v149_v14 = vsel %vm148_vm1, %v147_v13, %v145_v11  ;;  %718 = vmatmul.mubr.msk.bf16.vlgmr.msra.gmra.mrb[0].mxu0 %vm163_vm2, %v1116_v18 }
  0x79   :  { %v150_v16 = vpack.c.b16 %v149_v14, %v149_v14  ;;  %737 = vmatprep.mubr.msk.bf16.mxu0 %vm947_vm0, %v946_v0 }
  0x7b   :  { %702 = vmatmul.mubr.msk.bf16.vlgmr.msra.gmra.mrb[0].mxu1 %vm163_vm2, %v150_v16 }
  0x7c   :  { %706 = vmatpush3.bf16.msra.mxu1 %v758_v15  ;;  %709 = vmatprep.mubr.msk.bf16.mxu1 %vm947_vm0, %v946_v0 }
  0x7d   :  { %707 = vmatprep.subr.bf16.mxu1 %v946_v0 }
  0x80   :  { %708 = vmatpush3.bf16.msra.mxu1 %v759_v17 }
  0x81   :  { %721 = vmatprep.subr.bf16.mxu1 %v946_v0 }
  0x83   :  { %710 = vmatmul.mubr.msk.bf16.vlgmr.msra.gmra.mrb[4].mxu1 %vm163_vm2, %v1116_v18 }
  0x84   :  { %725 = vmatprep.mubr.msk.bf16.mxu1 %vm947_vm0, %v946_v0  ;;  %722 = vmatpush3.bf16.msra.mxu1 %v762_v23 }
  0x85   :  { %723 = vmatprep.subr.bf16.mxu1 %v946_v0 }
 0x14b   :  { %v332_v13 = vpop.f32.mrb[0].mxu0 }
 0x14c   :  { %v719_v14 = vpop.f32.mrb[1].mxu0 }
 0x14d   :  { %v335_v15 = vpop.f32.mrb[2].mxu0 }
 0x14e   :  { %v201_v26 = vpop.f32.mrb[0].mxu1  ;;  %v720_v16 = vpop.f32.mrb[3].mxu0 }
 0x14f   :  { %v202_v27 = vadd.f32 %v654_v24, %v201_v26  ;;  %v703_v28 = vpop.f32.mrb[1].mxu1  ;;  %v763_v24 = vld [vmem:[#allocation11 + $0x8] sm:$0xff]  }
 0x150   :  { %v204_v29 = vpop.f32.mrb[2].mxu1  ;;  %724 = vmatpush3.bf16.msra.mxu1 %v763_v24  ;;  %v765_v26 = vld [vmem:[%s1204_s10 + $0x8] sm:$0xff]  }
 0x151   :  { %v346_v30 = vrot.slane %v202_v27, %v345_v25  ;;  %v704_v31 = vpop.f32.mrb[3].mxu1  ;;  %v662_v27 = vld [vmem:[%s1201_s7] ss:$0 sm:$0xff] }
 0x152   :  { %v333_v28 = vadd.f32 %v662_v27, %v332_v13  ;;  %v336_v31 = vadd.f32 %v662_v27, %v335_v15 }
 0x153   :  { %v347_v32 = vcombine.high %v346_v30, %v346_v30  ;;  %v354_v33 = vrot.slane %v346_v30, %v345_v25 }
 0x155   :  { %v361_v36 = vrot.slane %v347_v32, %v345_v25  ;;  %v365_v40 = vrot.slane %v354_v33, %v1130_v34  ;;  %v764_v25 = vld [vmem:[%s1204_s10] sm:$0xff]  }
 0x156   :  { %v268_v37 = vpop.f32.mrb[4].mxu1  ;;  %730 = vmatpush3.bf16.msra.mxu0 %v764_v25 }
 0x157   :  { %v269_v38 = vadd.f32 %v658_v35, %v268_v37  ;;  %v711_v39 = vpop.f32.mrb[5].mxu1  ;;  %v369_v45 = vrot.slane %v361_v36, %v1130_v34  ;;  %731 = vmatprep.subr.bf16.mxu0 %v946_v0 }
 0x158   :  { %v271_v41 = vpop.f32.mrb[6].mxu1 }
 0x159   :  { %v272_v42 = vadd.f32 %v658_v35, %v271_v41  ;;  %v712_v43 = vpop.f32.mrb[7].mxu1  ;;  %v372_v44 = vmul.f32 %v365_v40, %v269_v38 }
 0x15a   :  { %732 = vmatpush3.bf16.msra.mxu0 %v765_v26 }
 0x15b   :  { %v374_v46 = vsel %vm163_vm2, %v372_v44, 0.0  ;;  %v373_v47 = vmul.f32 %v369_v45, %v272_v42  ;;  %733 = vmatprep.subr.bf16.mxu0 %v946_v0 }
 0x15c   :  { %375 = vadd.xlane.f32.xlu0 %v374_v46 }
 0x15d   :  { %v377_v48 = vsel %vm163_vm2, %v373_v47, 0.0 }
 0x160   :  { %378 = vadd.xlane.f32.xlu0 %v377_v48 }
 0x1e9   :  { %v376_v50 = vpop.xlane.xlu0 %375 }
 0x1ea   :  { %v387_v53 = vrot.slane %v376_v50, %v386_v51 }
 0x1ed   :  { %v379_v52 = vpop.xlane.xlu0 %378 }
 0x1ee   :  { %v391_v54 = vrot.slane %v379_v52, %v386_v51 }
 0x1f0   :  { %v392_v55 = vsel %vm148_vm1, %v391_v54, %v387_v53  ;;  %v766_v54 = vld [vmem:[%s1204_s10 + $0x10] sm:$0xff]  }
 0x1f1   :  { %v395_v56 = vsel %vm394_vm3, %v392_v55, -inf  ;;  %734 = vmatpush3.bf16.msra.mxu0 %v766_v54  ;;  %v767_v55 = vld [vmem:[%s1204_s10 + $0x18] sm:$0xff]   ;;  %s642_s10 = sshll.u32 %s950_s13, 4  ;;  %s643_s10 = int_to_ptr.vmem [resolvable:$true] %s642_s10 }
 0x1f2   :  { %396 = vmax.xlane.f32.xlu1 %v395_v56  ;;  %735 = vmatprep.subr.bf16.mxu0 %v946_v0  ;;  %v666_v56 = vld [vmem:[%s1203_s9] ss:$0 sm:$0xff]  ;;  %s906_s9 = scalar_lea.vmem %s643_s10, 32  ;;  %p911_p7 = scmp.lt.s32.totalorder %s643_s10, %s643_s10 }
 0x1f3   :  { %v670_v0 = vld [vmem:[%s1205_s11] ss:$0 sm:$0xff]  ;;  %p907_p6 = scmp.ne.s32.totalorder %s643_s10, %s906_s9  ;;  %p912_p8 = scmp.lt.s32.totalorder %s906_s9, %s906_s9 }
 0x1f5   :  { %736 = vmatpush3.bf16.msra.mxu0 %v767_v55  ;;  %p913_p9 = por %p912_p8, %p911_p7 }
 0x1f7   :  { %p914_p10 = pnand %p913_p9, %p907_p6 }
 0x27f   :  { %v397_v59 = vpop.xlane.xlu1 %396 }
 0x280   :  { %v402_v60 = vrot.slane %v397_v59, %v1130_v34  ;;  %v406_v61 = vrot.slane %v397_v59, %v405_v58 }
 0x282   :  { %v409_v62 = vsub.f32 %v376_v50, %v402_v60  ;;  %v410_v63 = vsub.f32 %v379_v52, %v406_v61 }
 0x284   :  { %v411_v1 = vmul.f32 1.442695, %v409_v62  ;;  %v413_v2 = vmul.f32 1.442695, %v410_v63 }
 0x286   :  { %768 = vpow2.f32 %v411_v1 }
 0x287   :  { %770 = vpow2.f32 %v413_v2 }
 0x290   :  { %v769_v3 = vpop.eup %768 }
 0x291   :  { %v771_v4 = vpop.eup %770  ;;  %418 = vperm.xlu1 %754, %v769_v3  }
 0x292   :  { %421 = vperm.xlu0 %755, %v771_v4  }
 0x310   :  { %v419_v7 = vpop.permute.xlu1 %418 }
 0x311   :  { %v422_v8 = vpop.permute.xlu0 %421  ;;  %v426_v9 = vrot.slane %v419_v7, %v386_v51 }
 0x312   :  { %v430_v10 = vrot.slane %v422_v8, %v386_v51 }
 0x314   :  { %v431_v11 = vsel %vm148_vm1, %v430_v10, %v426_v9 }
 0x315   :  { %v433_v12 = vsel %vm394_vm3, %v431_v11, 0.0 }
 0x316   :  { %434 = vadd.xlane.f32.xlu1 %v433_v12 }
 0x3a3   :  { %v435_v17 = vpop.xlane.xlu1 %434 }
 0x3a4   :  { %772 = vrcp.f32 %v435_v17 }
 0x3ae   :  { %v773_v19 = vpop.eup %772 }
 0x3af   :  { %v441_v18 = vrot.slane %v773_v19, %v1130_v34  ;;  %v445_v21 = vrot.slane %v773_v19, %v405_v58 }
 0x3b1   :  { %v448_v20 = vmul.f32 %v769_v3, %v441_v18  ;;  %v449_v22 = vmul.f32 %v771_v4, %v445_v21 }
 0x3b3   :  { %452 = vperm.xlu0 %755, %v448_v20  }
 0x3b7   :  { %457 = vperm.xlu0 %755, %v449_v22  }
 0x432   :  { %v453_v29 = vpop.permute.xlu0 %452 }
 0x433   :  { %v460_v30 = vmul.f32 %v453_v29, %v333_v28 }
 0x435   :  { %v462_v32 = vsel %vm163_vm2, %v460_v30, 0.0 }
 0x436   :  { %v463_v33 = vrot.slane %v462_v32, 4  ;;  %v458_v34 = vpop.permute.xlu0 %457 }
 0x437   :  { %v461_v35 = vmul.f32 %v458_v34, %v336_v31 }
 0x438   :  { %v464_v36 = vadd.f32 %v463_v33, %v462_v32 }
 0x439   :  { %v469_v37 = vsel %vm163_vm2, %v461_v35, 0.0 }
 0x43a   :  { %v465_v38 = vrot.slane %v464_v36, 2  ;;  %v470_v39 = vrot.slane %v469_v37, 4 }
 0x43c   :  { %v466_v40 = vadd.f32 %v465_v38, %v464_v36  ;;  %v471_v41 = vadd.f32 %v470_v39, %v469_v37 }
 0x43e   :  { %v467_v42 = vrot.slane %v466_v40, 1  ;;  %v472_v43 = vrot.slane %v471_v41, 2 }
 0x440   :  { %v468_v44 = vadd.f32 %v467_v42, %v466_v40  ;;  %v473_v45 = vadd.f32 %v472_v43, %v471_v41 }
 0x442   :  { %v474_v46 = vrot.slane %v473_v45, 1  ;;  %v476_v47 = vpack.c.bf16 %v468_v44, %v468_v44 }
 0x444   :  { %v475_v48 = vadd.f32 %v474_v46, %v473_v45  ;;  %v491_v50 = vunpack.c.l.b16 %v476_v47 }
 0x446   :  { %v477_v49 = vpack.c.bf16 %v475_v48, %v475_v48 }
 0x448   :  { %v492_v51 = vunpack.c.l.b16 %v477_v49 }
 0x44a   :  { %v493_v52 = vsel %vm148_vm1, %v492_v51, %v491_v50 }
 0x44b   :  { %v494_v53 = vpack.c.b16 %v493_v52, %v493_v52 }
 0x44d   :  { %726 = vmatmul.mubr.msk.bf16.vlgmr.msra.gmra.mrb[8].mxu1 %vm163_vm2, %v494_v53 }
 0x520   :  { %v544_v57 = vpop.f32.mrb[8].mxu1 }
 0x521   :  { %v545_v58 = vadd.f32 %v666_v56, %v544_v57  ;;  %v727_v59 = vpop.f32.mrb[9].mxu1 }
 0x522   :  { %v547_v60 = vpop.f32.mrb[10].mxu1 }
 0x523   :  { %v550_v61 = vmax.f32 %v545_v58, 0.0  ;;  %v728_v62 = vpop.f32.mrb[11].mxu1 }
 0x525   :  { %v551_v63 = vpack.c.bf16 %v550_v61, %v550_v61 }
 0x527   :  { %738 = vmatmul.mubr.msk.bf16.vlgmr.msra.gmra.mrb[4].mxu0 %vm591_vm4, %v551_v63 }
 0x5fa   :  { %v629_v1 = vpop.f32.mrb[4].mxu0 }
 0x5fb   :  { %v630_v2 = vadd.f32 %v670_v0, %v629_v1  ;;  %v739_v3 = vpop.f32.mrb[5].mxu0 }
 0x5fc   :  { %v632_v4 = vpop.f32.mrb[6].mxu0 }
 0x5fd   :  { %635 = vst [vmem:[#allocation13] sm:$0x3] %v630_v2  ;;  %v740_v5 = vpop.f32.mrb[7].mxu0 }
 0x5fe   :  { %917 = shalt.err (!%p914_p10)
}
 0x5ff   :  { %s918_s11 = scalar_lea.hbm %s1206_s12, 32 }
 0x600   :  { %p919_p11 = scmp.ne.s32.totalorder %s1206_s12, %s918_s11  ;;  %p922_p12 = scmp.lt.u32.totalorder %s918_s11, %s1206_s12 }
 0x602   :  { %p924_p13 = pnand %p922_p12, %p919_p11 }
 0x604   :  { %927 = shalt.err (!%p924_p13)
}
 0x605   :  { %645 = dma.vmem_to_hbm [thread:$0]  %s643_s10, 32, %s1206_s12, [#allocation4]  }
 0x606   :  { %936 = dma.done.wait [#allocation4], 32  }
 0x607   :  { %937 = vsyncadd [#allocation4], 4294967264 }
 0x608   :  { %649 = vsyncpa [#allocation3], 1 }
 0x609   :  { %650 = vsyncpa [#allocation6], 1 }
 0x60a   :  { %651 = vsyncpa [#allocation9], 1 }
 0x60b   :  { %652 = vsyncpa [#allocation12], 1 }
 0x60c   :  { %653 = vsyncpa [#allocation4], 1 }

</bundles_post_ra>
